<compile_context>
chip_gen: v6e
topology: v6e:2x2x1
jax: 0.10.0
libtpu: 0.0.40
codegen_flags: <defaults>
</compile_context>

<pallas_src>
import jax
import jax.numpy as jnp
from jax.experimental import pallas as pl
from jax.experimental.pallas import tpu as pltpu

NEG_SLOPE = 0.2   # nn.LeakyReLU(negative_slope=0.2)
BN_EPS = 1e-5     # nn.BatchNorm1d default eps

_VMEM = pl.BlockSpec(memory_space=pltpu.MemorySpace.VMEM)


# ----------------------------- shared math helpers -----------------------------

def _leaky(x):
    # Valid because 0 < NEG_SLOPE < 1: max(x, a*x) == LeakyReLU(x). One VPU op.
    return jnp.maximum(x, NEG_SLOPE * x)


def _bn_train(h, gamma, beta):
    # PyTorch BatchNorm1d training mode: biased batch statistics over axis 0.
    # Affine folded into a single per-feature scale/shift -> mul+add per element.
    mean = jnp.mean(h, axis=0, keepdims=True)
    var = jnp.mean(h * h, axis=0, keepdims=True) - mean * mean
    scale = gamma * jax.lax.rsqrt(var + BN_EPS)      # rsqrt -> EUP slot (free-ish)
    shift = beta - mean * scale
    return h * scale + shift


def _block_fwd(x, prm, final_nl):
    """One ResBlock applied to an f32 (B, FinP) activation held in vregs/VMEM.

    `prm` maps names -> Refs.  Matmuls are fed bf16 (activation cast only at the
    dot site), accumulate in f32; all BN / LeakyReLU math stays f32.
    fc1/fc2 biases are omitted (cancelled by training-mode BN); fc3's bias kept.
    """
    x_bf = x.astype(jnp.bfloat16)
    p2 = prm["p2"][...]                                  # (2|3, FoutP)
    if "w13" in prm:
        # Projection path: one dot x @ [w1 | w3] (N = HnP + FoutP) then slice.
        hn = prm["p1"].shape[1]
        h_all = jnp.dot(x_bf, prm["w13"][...],
                        preferred_element_type=jnp.float32)
        h = h_all[:, :hn]                                # fc1 output (bias dropped)
        xin = _leaky(h_all[:, hn:] + p2[2:3])            # fc3 output + b3
    else:
        h = jnp.dot(x_bf, prm["w1"][...],
                    preferred_element_type=jnp.float32)
        xin = x                                          # identity residual
    p1 = prm["p1"][...]                                  # (2, HnP): gamma1/beta1
    h = _leaky(_bn_train(h, p1[0:1], p1[1:2]))
    h = jnp.dot(h.astype(jnp.bfloat16), prm["w2"][...],
                preferred_element_type=jnp.float32)
    h = _bn_train(h, p2[0:1], p2[1:2])                   # gamma2/beta2
    out = xin + h
    return _leaky(out) if final_nl else out


# ------------------------------- fused wrapper ----------------------------------

_PROJ_KEYS = ("w13", "p1", "w2", "p2")
_IDENT_KEYS = ("w1", "p1", "w2", "p2")


def _block_keys(p):
    return _PROJ_KEYS if "w13" in p else _IDENT_KEYS


def resblocks_apply(blocks, x, final_nl=True):
    """Run one or more ResBlocks back-to-back inside a SINGLE pallas_call.

    One launch amortizes per-call overhead, every inter-block activation stays
    in VMEM/vregs, and all blocks' weights stream in under a single call.
    `final_nl` controls only the last block (intermediate blocks use the PyTorch
    default True).  Returns the lane-padded (B, FoutP) activation in f32.
    """
    B = x.shape[0]
    first_w = blocks[0]["w13"] if "w13" in blocks[0] else blocks[0]["w1"]
    FinP = first_w.shape[0]
    if x.shape[1] != FinP:                               # lane-pad input features
        x = jnp.pad(x, ((0, 0), (0, FinP - x.shape[1])))
    FoutP = blocks[-1]["w2"].shape[1]

    layouts = [_block_keys(p) for p in blocks]
    flat = [x]
    for p, keys in zip(blocks, layouts):
        flat.extend(p[k] for k in keys)

    def kernel(*refs):
        x_ref, *prm_refs = refs[:-1]
        o_ref = refs[-1]
        h = x_ref[...]
        i = 0
        for li, keys in enumerate(layouts):
            prm = dict(zip(keys, prm_refs[i:i + len(keys)]))
            i += len(keys)
            last = li == len(layouts) - 1
            h = _block_fwd(h, prm, final_nl=(final_nl if last else True))
        o_ref[...] = h

    return pl.pallas_call(
        kernel,
        out_shape=jax.ShapeDtypeStruct((B, FoutP), jnp.float32),
        in_specs=[_VMEM] * len(flat),
        out_specs=_VMEM,
        # VMEM use here is <1 MiB.  When scaling n_neurons / stacking many layers,
        # add pltpu.CompilerParams(vmem_limit_bytes=...) (v7x: 64 MiB total) and
        # switch to a layer-grid with stacked weights so BlockSpec pipelining
        # prefetches layer i+1 weights during layer i compute.
    )(*flat)


# --------------------------- parameter creation -----------------------------

def _round_up(n, m=128):
    return ((n + m - 1) // m) * m


def init_resblock_params(key, Fin, Fout, n_neurons=512, weight_dtype=jnp.bfloat16):
    """PyTorch-style init; feature dims zero-padded to multiples of 128.

    Padding invariant: padded weight rows/cols and padded bias entries are
    exactly 0, so padded activation lanes stay exactly 0 through BN/residual.
    fc1/fc2 biases are intentionally dropped (cancelled by training-mode BN);
    this would be WRONG for eval-mode BN with running statistics.
    """
    FinP, HnP, FoutP = _round_up(Fin), _round_up(n_neurons), _round_up(Fout)
    k1, k2, k3, k3b = jax.random.split(key, 4)

    def lin_w(k, fin, fout, finP, foutP):
        bound = fin ** -0.5
        w = jax.random.uniform(k, (fin, fout), jnp.float32, -bound, bound)
        return jnp.zeros((finP, foutP), jnp.float32).at[:fin, :fout].set(w)

    w1 = lin_w(k1, Fin, n_neurons, FinP, HnP)
    w2 = lin_w(k2, n_neurons, Fout, HnP, FoutP)
    g1, b1 = jnp.ones((HnP,), jnp.float32), jnp.zeros((HnP,), jnp.float32)
    g2, b2 = jnp.ones((FoutP,), jnp.float32), jnp.zeros((FoutP,), jnp.float32)

    p = {"p1": jnp.stack([g1, b1]),                   # (2, HnP): gamma1/beta1
         "w2": w2.astype(weight_dtype)}
    if Fin != Fout:
        w3 = lin_w(k3, Fin, Fout, FinP, FoutP)
        bound = Fin ** -0.5
        b3 = jax.random.uniform(k3b, (Fout,), jnp.float32, -bound, bound)
        b3 = jnp.zeros((FoutP,), jnp.float32).at[:Fout].set(b3)
        # fc1 and fc3 both consume x: merge into one (FinP, HnP+FoutP) rhs so a
        # single MXU pass computes both (better fill of the 256-wide MXU).
        p["w13"] = jnp.concatenate([w1, w3], axis=1).astype(weight_dtype)
        p["p2"] = jnp.stack([g2, b2, b3])             # (3, FoutP): gamma2/beta2/b3
    else:
        p["w1"] = w1.astype(weight_dtype)
        p["p2"] = jnp.stack([g2, b2])                 # (2, FoutP): gamma2/beta2
    return p


# ------------------------------ JAX reference --------------------------------

def resblock_ref(p, x, final_nl=True):
    """Pure-JAX reference: same bf16 weights, same math, un-merged matmuls."""
    FinP = (p["w13"] if "w13" in p else p["w1"]).shape[0]
    if x.shape[1] != FinP:
        x = jnp.pad(x, ((0, 0), (0, FinP - x.shape[1])))
    x_bf = x.astype(jnp.bfloat16)
    p1, p2 = p["p1"], p["p2"]
    if "w13" in p:
        hn = p1.shape[1]
        w1, w3 = p["w13"][:, :hn], p["w13"][:, hn:]
        xin = _leaky(jnp.dot(x_bf, w3, preferred_element_type=jnp.float32) + p2[2:3])
    else:
        w1 = p["w1"]
        xin = x
    h = jnp.dot(x_bf, w1, preferred_element_type=jnp.float32)
    h = _leaky(_bn_train(h, p1[0:1], p1[1:2]))
    h = jnp.dot(h.astype(jnp.bfloat16), p["w2"], preferred_element_type=jnp.float32)
    h = _bn_train(h, p2[0:1], p2[1:2])
    out = xin + h
    return _leaky(out) if final_nl else out


# ---------------------------------- main ------------------------------------

if __name__ == "__main__":
    B = 8
    Fin_a, Hn_a, Fout_a = 200, 256, 128   # Fin != Fout -> fc3 projection (Fin pads to 256)
    Fin_b, Hn_b, Fout_b = 128, 192, 128   # Fin == Fout -> identity residual (hidden pads to 256)

    ka, kb, kx = jax.random.split(jax.random.PRNGKey(0), 3)
    params_a = init_resblock_params(ka, Fin_a, Fout_a, Hn_a)
    params_b = init_resblock_params(kb, Fin_b, Fout_b, Hn_b)
    x = jax.random.normal(kx, (B, Fin_a), jnp.float32)

    @jax.jit
    def forward(pa, pb, xin):
        # Both ResBlocks fused into ONE pallas_call (proj path then identity path).
        y = resblocks_apply([pa, pb], xin, final_nl=True)
        return y[:, :Fout_b]

    out = forward(params_a, params_b, x)
    jax.block_until_ready(out)
    assert out.shape == (B, Fout_b)

    # pure-JAX reference (same bf16 weights, same training-mode-BN math)
    y_ref = resblock_ref(params_a, x, final_nl=True)
    y_ref = resblock_ref(params_b, y_ref, final_nl=True)[:, :Fout_b]
    err = float(jnp.max(jnp.abs(out - y_ref)))
    assert err < 2e-3, f"mismatch vs reference: max|diff|={err}"

    print("KERNEL_OK")
</pallas_src>

<mosaic_0001>
module attributes {stable_mosaic.version = 11 : i64} {
  func.func @kernel(%arg0: memref<8x256xf32, #tpu.memory_space<vmem>>, %arg1: memref<256x384xbf16, #tpu.memory_space<vmem>>, %arg2: memref<2x256xf32, #tpu.memory_space<vmem>>, %arg3: memref<256x128xbf16, #tpu.memory_space<vmem>>, %arg4: memref<3x128xf32, #tpu.memory_space<vmem>>, %arg5: memref<128x256xbf16, #tpu.memory_space<vmem>>, %arg6: memref<2x256xf32, #tpu.memory_space<vmem>>, %arg7: memref<256x128xbf16, #tpu.memory_space<vmem>>, %arg8: memref<2x128xf32, #tpu.memory_space<vmem>>, %arg9: memref<8x128xf32, #tpu.memory_space<vmem>>) attributes {dimension_semantics = [], scalar_prefetch = 0 : i64, scratch_operands = 0 : i64, tpu.core_type = #tpu.core_type<tc>} {
    %c0 = arith.constant 0 : index
    %c0_0 = arith.constant 0 : index
    %0 = vector.load %arg0[%c0, %c0_0] : memref<8x256xf32, #tpu.memory_space<vmem>>, vector<8x256xf32>
    %1 = arith.truncf %0 : vector<8x256xf32> to vector<8x256xbf16>
    %c0_1 = arith.constant 0 : index
    %c0_2 = arith.constant 0 : index
    %2 = vector.load %arg4[%c0_1, %c0_2] : memref<3x128xf32, #tpu.memory_space<vmem>>, vector<3x128xf32>
    %c0_3 = arith.constant 0 : index
    %c0_4 = arith.constant 0 : index
    %3 = vector.load %arg1[%c0_3, %c0_4] : memref<256x384xbf16, #tpu.memory_space<vmem>>, vector<256x384xbf16>
    %cst = arith.constant dense<0.000000e+00> : vector<8x384xf32>
    %4 = tpu.matmul %1, %3, %cst {dimension_numbers = #tpu.dot_dimension_numbers<[1], [0], [0], [1], [0, 0, 1, 1], [], []>} : vector<8x256xbf16>, vector<256x384xbf16>, vector<8x384xf32> -> vector<8x384xf32>
    %5 = vector.extract_strided_slice %4 {offsets = [0, 0], sizes = [8, 256], strides = [1, 1]} : vector<8x384xf32> to vector<8x256xf32>
    %6 = vector.extract_strided_slice %4 {offsets = [0, 256], sizes = [8, 128], strides = [1, 1]} : vector<8x384xf32> to vector<8x128xf32>
    %7 = vector.extract_strided_slice %2 {offsets = [2, 0], sizes = [1, 128], strides = [1, 1]} : vector<3x128xf32> to vector<1x128xf32>
    %8 = vector.broadcast %7 : vector<1x128xf32> to vector<8x128xf32>
    %9 = arith.addf %6, %8 : vector<8x128xf32>
    %cst_5 = arith.constant 2.000000e-01 : f32
    %10 = vector.broadcast %cst_5 : f32 to vector<8x128xf32>
    %11 = arith.mulf %10, %9 : vector<8x128xf32>
    %12 = arith.maximumf %9, %11 : vector<8x128xf32>
    %c0_6 = arith.constant 0 : index
    %c0_7 = arith.constant 0 : index
    %13 = vector.load %arg2[%c0_6, %c0_7] : memref<2x256xf32, #tpu.memory_space<vmem>>, vector<2x256xf32>
    %14 = vector.extract_strided_slice %13 {offsets = [0, 0], sizes = [1, 256], strides = [1, 1]} : vector<2x256xf32> to vector<1x256xf32>
    %15 = vector.extract_strided_slice %13 {offsets = [1, 0], sizes = [1, 256], strides = [1, 1]} : vector<2x256xf32> to vector<1x256xf32>
    %cst_8 = arith.constant dense<0.000000e+00> : vector<256xf32>
    %16 = vector.multi_reduction <add>, %5, %cst_8 [0] : vector<8x256xf32> to vector<256xf32>
    %17 = vector.shape_cast %16 : vector<256xf32> to vector<1x256xf32>
    %cst_9 = arith.constant 8.000000e+00 : f32
    %18 = vector.broadcast %cst_9 : f32 to vector<1x256xf32>
    %19 = arith.divf %17, %18 : vector<1x256xf32>
    %20 = arith.mulf %5, %5 : vector<8x256xf32>
    %cst_10 = arith.constant dense<0.000000e+00> : vector<256xf32>
    %21 = vector.multi_reduction <add>, %20, %cst_10 [0] : vector<8x256xf32> to vector<256xf32>
    %22 = vector.shape_cast %21 : vector<256xf32> to vector<1x256xf32>
    %cst_11 = arith.constant 8.000000e+00 : f32
    %23 = vector.broadcast %cst_11 : f32 to vector<1x256xf32>
    %24 = arith.divf %22, %23 : vector<1x256xf32>
    %25 = arith.mulf %19, %19 : vector<1x256xf32>
    %26 = arith.subf %24, %25 : vector<1x256xf32>
    %cst_12 = arith.constant 9.99999974E-6 : f32
    %27 = vector.broadcast %cst_12 : f32 to vector<1x256xf32>
    %28 = arith.addf %26, %27 : vector<1x256xf32>
    %29 = math.rsqrt %28 : vector<1x256xf32>
    %30 = arith.mulf %14, %29 : vector<1x256xf32>
    %31 = arith.mulf %19, %30 : vector<1x256xf32>
    %32 = arith.subf %15, %31 : vector<1x256xf32>
    %33 = vector.broadcast %30 : vector<1x256xf32> to vector<8x256xf32>
    %34 = arith.mulf %5, %33 : vector<8x256xf32>
    %35 = vector.broadcast %32 : vector<1x256xf32> to vector<8x256xf32>
    %36 = arith.addf %34, %35 : vector<8x256xf32>
    %cst_13 = arith.constant 2.000000e-01 : f32
    %37 = vector.broadcast %cst_13 : f32 to vector<8x256xf32>
    %38 = arith.mulf %37, %36 : vector<8x256xf32>
    %39 = arith.maximumf %36, %38 : vector<8x256xf32>
    %40 = arith.truncf %39 : vector<8x256xf32> to vector<8x256xbf16>
    %c0_14 = arith.constant 0 : index
    %c0_15 = arith.constant 0 : index
    %41 = vector.load %arg3[%c0_14, %c0_15] : memref<256x128xbf16, #tpu.memory_space<vmem>>, vector<256x128xbf16>
    %cst_16 = arith.constant dense<0.000000e+00> : vector<8x128xf32>
    %42 = tpu.matmul %40, %41, %cst_16 {dimension_numbers = #tpu.dot_dimension_numbers<[1], [0], [0], [1], [0, 0, 1, 1], [], []>} : vector<8x256xbf16>, vector<256x128xbf16>, vector<8x128xf32> -> vector<8x128xf32>
    %43 = vector.extract_strided_slice %2 {offsets = [0, 0], sizes = [1, 128], strides = [1, 1]} : vector<3x128xf32> to vector<1x128xf32>
    %44 = vector.extract_strided_slice %2 {offsets = [1, 0], sizes = [1, 128], strides = [1, 1]} : vector<3x128xf32> to vector<1x128xf32>
    %cst_17 = arith.constant dense<0.000000e+00> : vector<128xf32>
    %45 = vector.multi_reduction <add>, %42, %cst_17 [0] : vector<8x128xf32> to vector<128xf32>
    %46 = vector.shape_cast %45 : vector<128xf32> to vector<1x128xf32>
    %cst_18 = arith.constant 8.000000e+00 : f32
    %47 = vector.broadcast %cst_18 : f32 to vector<1x128xf32>
    %48 = arith.divf %46, %47 : vector<1x128xf32>
    %49 = arith.mulf %42, %42 : vector<8x128xf32>
    %cst_19 = arith.constant dense<0.000000e+00> : vector<128xf32>
    %50 = vector.multi_reduction <add>, %49, %cst_19 [0] : vector<8x128xf32> to vector<128xf32>
    %51 = vector.shape_cast %50 : vector<128xf32> to vector<1x128xf32>
    %cst_20 = arith.constant 8.000000e+00 : f32
    %52 = vector.broadcast %cst_20 : f32 to vector<1x128xf32>
    %53 = arith.divf %51, %52 : vector<1x128xf32>
    %54 = arith.mulf %48, %48 : vector<1x128xf32>
    %55 = arith.subf %53, %54 : vector<1x128xf32>
    %cst_21 = arith.constant 9.99999974E-6 : f32
    %56 = vector.broadcast %cst_21 : f32 to vector<1x128xf32>
    %57 = arith.addf %55, %56 : vector<1x128xf32>
    %58 = math.rsqrt %57 : vector<1x128xf32>
    %59 = arith.mulf %43, %58 : vector<1x128xf32>
    %60 = arith.mulf %48, %59 : vector<1x128xf32>
    %61 = arith.subf %44, %60 : vector<1x128xf32>
    %62 = vector.broadcast %59 : vector<1x128xf32> to vector<8x128xf32>
    %63 = arith.mulf %42, %62 : vector<8x128xf32>
    %64 = vector.broadcast %61 : vector<1x128xf32> to vector<8x128xf32>
    %65 = arith.addf %63, %64 : vector<8x128xf32>
    %66 = arith.addf %12, %65 : vector<8x128xf32>
    %cst_22 = arith.constant 2.000000e-01 : f32
    %67 = vector.broadcast %cst_22 : f32 to vector<8x128xf32>
    %68 = arith.mulf %67, %66 : vector<8x128xf32>
    %69 = arith.maximumf %66, %68 : vector<8x128xf32>
    %70 = arith.truncf %69 : vector<8x128xf32> to vector<8x128xbf16>
    %c0_23 = arith.constant 0 : index
    %c0_24 = arith.constant 0 : index
    %71 = vector.load %arg8[%c0_23, %c0_24] : memref<2x128xf32, #tpu.memory_space<vmem>>, vector<2x128xf32>
    %c0_25 = arith.constant 0 : index
    %c0_26 = arith.constant 0 : index
    %72 = vector.load %arg5[%c0_25, %c0_26] : memref<128x256xbf16, #tpu.memory_space<vmem>>, vector<128x256xbf16>
    %cst_27 = arith.constant dense<0.000000e+00> : vector<8x256xf32>
    %73 = tpu.matmul %70, %72, %cst_27 {dimension_numbers = #tpu.dot_dimension_numbers<[1], [0], [0], [1], [0, 0, 1, 1], [], []>} : vector<8x128xbf16>, vector<128x256xbf16>, vector<8x256xf32> -> vector<8x256xf32>
    %c0_28 = arith.constant 0 : index
    %c0_29 = arith.constant 0 : index
    %74 = vector.load %arg6[%c0_28, %c0_29] : memref<2x256xf32, #tpu.memory_space<vmem>>, vector<2x256xf32>
    %75 = vector.extract_strided_slice %74 {offsets = [0, 0], sizes = [1, 256], strides = [1, 1]} : vector<2x256xf32> to vector<1x256xf32>
    %76 = vector.extract_strided_slice %74 {offsets = [1, 0], sizes = [1, 256], strides = [1, 1]} : vector<2x256xf32> to vector<1x256xf32>
    %cst_30 = arith.constant dense<0.000000e+00> : vector<256xf32>
    %77 = vector.multi_reduction <add>, %73, %cst_30 [0] : vector<8x256xf32> to vector<256xf32>
    %78 = vector.shape_cast %77 : vector<256xf32> to vector<1x256xf32>
    %cst_31 = arith.constant 8.000000e+00 : f32
    %79 = vector.broadcast %cst_31 : f32 to vector<1x256xf32>
    %80 = arith.divf %78, %79 : vector<1x256xf32>
    %81 = arith.mulf %73, %73 : vector<8x256xf32>
    %cst_32 = arith.constant dense<0.000000e+00> : vector<256xf32>
    %82 = vector.multi_reduction <add>, %81, %cst_32 [0] : vector<8x256xf32> to vector<256xf32>
    %83 = vector.shape_cast %82 : vector<256xf32> to vector<1x256xf32>
    %cst_33 = arith.constant 8.000000e+00 : f32
    %84 = vector.broadcast %cst_33 : f32 to vector<1x256xf32>
    %85 = arith.divf %83, %84 : vector<1x256xf32>
    %86 = arith.mulf %80, %80 : vector<1x256xf32>
    %87 = arith.subf %85, %86 : vector<1x256xf32>
    %cst_34 = arith.constant 9.99999974E-6 : f32
    %88 = vector.broadcast %cst_34 : f32 to vector<1x256xf32>
    %89 = arith.addf %87, %88 : vector<1x256xf32>
    %90 = math.rsqrt %89 : vector<1x256xf32>
    %91 = arith.mulf %75, %90 : vector<1x256xf32>
    %92 = arith.mulf %80, %91 : vector<1x256xf32>
    %93 = arith.subf %76, %92 : vector<1x256xf32>
    %94 = vector.broadcast %91 : vector<1x256xf32> to vector<8x256xf32>
    %95 = arith.mulf %73, %94 : vector<8x256xf32>
    %96 = vector.broadcast %93 : vector<1x256xf32> to vector<8x256xf32>
    %97 = arith.addf %95, %96 : vector<8x256xf32>
    %cst_35 = arith.constant 2.000000e-01 : f32
    %98 = vector.broadcast %cst_35 : f32 to vector<8x256xf32>
    %99 = arith.mulf %98, %97 : vector<8x256xf32>
    %100 = arith.maximumf %97, %99 : vector<8x256xf32>
    %101 = arith.truncf %100 : vector<8x256xf32> to vector<8x256xbf16>
    %c0_36 = arith.constant 0 : index
    %c0_37 = arith.constant 0 : index
    %102 = vector.load %arg7[%c0_36, %c0_37] : memref<256x128xbf16, #tpu.memory_space<vmem>>, vector<256x128xbf16>
    %cst_38 = arith.constant dense<0.000000e+00> : vector<8x128xf32>
    %103 = tpu.matmul %101, %102, %cst_38 {dimension_numbers = #tpu.dot_dimension_numbers<[1], [0], [0], [1], [0, 0, 1, 1], [], []>} : vector<8x256xbf16>, vector<256x128xbf16>, vector<8x128xf32> -> vector<8x128xf32>
    %104 = vector.extract_strided_slice %71 {offsets = [0, 0], sizes = [1, 128], strides = [1, 1]} : vector<2x128xf32> to vector<1x128xf32>
    %105 = vector.extract_strided_slice %71 {offsets = [1, 0], sizes = [1, 128], strides = [1, 1]} : vector<2x128xf32> to vector<1x128xf32>
    %cst_39 = arith.constant dense<0.000000e+00> : vector<128xf32>
    %106 = vector.multi_reduction <add>, %103, %cst_39 [0] : vector<8x128xf32> to vector<128xf32>
    %107 = vector.shape_cast %106 : vector<128xf32> to vector<1x128xf32>
    %cst_40 = arith.constant 8.000000e+00 : f32
    %108 = vector.broadcast %cst_40 : f32 to vector<1x128xf32>
    %109 = arith.divf %107, %108 : vector<1x128xf32>
    %110 = arith.mulf %103, %103 : vector<8x128xf32>
    %cst_41 = arith.constant dense<0.000000e+00> : vector<128xf32>
    %111 = vector.multi_reduction <add>, %110, %cst_41 [0] : vector<8x128xf32> to vector<128xf32>
    %112 = vector.shape_cast %111 : vector<128xf32> to vector<1x128xf32>
    %cst_42 = arith.constant 8.000000e+00 : f32
    %113 = vector.broadcast %cst_42 : f32 to vector<1x128xf32>
    %114 = arith.divf %112, %113 : vector<1x128xf32>
    %115 = arith.mulf %109, %109 : vector<1x128xf32>
    %116 = arith.subf %114, %115 : vector<1x128xf32>
    %cst_43 = arith.constant 9.99999974E-6 : f32
    %117 = vector.broadcast %cst_43 : f32 to vector<1x128xf32>
    %118 = arith.addf %116, %117 : vector<1x128xf32>
    %119 = math.rsqrt %118 : vector<1x128xf32>
    %120 = arith.mulf %104, %119 : vector<1x128xf32>
    %121 = arith.mulf %109, %120 : vector<1x128xf32>
    %122 = arith.subf %105, %121 : vector<1x128xf32>
    %123 = vector.broadcast %120 : vector<1x128xf32> to vector<8x128xf32>
    %124 = arith.mulf %103, %123 : vector<8x128xf32>
    %125 = vector.broadcast %122 : vector<1x128xf32> to vector<8x128xf32>
    %126 = arith.addf %124, %125 : vector<8x128xf32>
    %127 = arith.addf %69, %126 : vector<8x128xf32>
    %cst_44 = arith.constant 2.000000e-01 : f32
    %128 = vector.broadcast %cst_44 : f32 to vector<8x128xf32>
    %129 = arith.mulf %128, %127 : vector<8x128xf32>
    %130 = arith.maximumf %127, %129 : vector<8x128xf32>
    %c0_45 = arith.constant 0 : index
    %c0_46 = arith.constant 0 : index
    %131 = vector.load %arg9[%c0_45, %c0_46] : memref<8x128xf32, #tpu.memory_space<vmem>>, vector<8x128xf32>
    tpu.vector_store %arg9[%c0_45, %c0_46], %130 {strides = array<i32>} : memref<8x128xf32, #tpu.memory_space<vmem>>, vector<8x128xf32>,
    return
  }
}

</mosaic_0001>

<bundles_post_ra>
// kernel: forward.1
= control target key start
LH: loop header
LB: loop body
LE: loop exit
PB: predicated region body
PF: predicated region fallthrough
CT: control target
= control target key end

     0   :  { %14 = vsyncpa [#allocation3], 0  ;;  %s1881_s0 = inlined_call_operand.vmem [shape: f32[8,256], index: 0, kind: input, shape index: {}]   ;;  %s1882_s1 = inlined_call_operand.hbm [shape: bf16[256,384], index: 1, kind: input, shape index: {}]   ;;  %s1883_s2 = inlined_call_operand.vmem [shape: f32[2,256], index: 2, kind: input, shape index: {}]   ;;  %s1884_s3 = inlined_call_operand.hbm [shape: bf16[256,128], index: 3, kind: input, shape index: {}]   ;;  %s1885_s4 = inlined_call_operand.vmem [shape: f32[3,128], index: 4, kind: input, shape index: {}]   ;;  %s1886_s5 = inlined_call_operand.hbm [shape: bf16[128,256], index: 5, kind: input, shape index: {}]   ;;  %s1887_s6 = inlined_call_operand.vmem [shape: f32[2,256], index: 6, kind: input, shape index: {}]   ;;  %s1888_s7 = inlined_call_operand.hbm [shape: bf16[256,128], index: 7, kind: input, shape index: {}]   ;;  %s1889_s8 = inlined_call_operand.vmem [shape: f32[2,128], index: 8, kind: input, shape index: {}]   ;;  %s1890_s9 = inlined_call_operand.hbm [shape: f32[8,128], index: 9, kind: output, shape index: {}]  }
   0x1   :  { %15 = vsyncpa [#allocation6], 0 }
   0x2   :  { %16 = vsyncpa [#allocation9], 0 }
   0x3   :  { %17 = vsyncpa [#allocation4], 0  ;;  %s1715_s30 = smov [#allocation5]  }
   0x4   :  { %s39_s10 = sshll.u32 %s1715_s30, 4  ;;  %s40_s10 = int_to_ptr.vmem [resolvable:$true] %s39_s10 }
   0x5   :  { %s1615_s11 = scalar_lea.vmem %s40_s10, 2048  ;;  %p1620_p1 = scmp.lt.s32.totalorder %s40_s10, %s40_s10 }
   0x6   :  { %p1616_p0 = scmp.ne.s32.totalorder %s40_s10, %s1615_s11  ;;  %p1621_p2 = scmp.lt.s32.totalorder %s1615_s11, %s1615_s11 }
   0x8   :  { %p1622_p3 = por %p1621_p2, %p1620_p1 }
   0xa   :  { %p1623_p4 = pnand %p1622_p3, %p1616_p0 }
   0xc   :  { %1626 = shalt.err (!%p1623_p4)
}
   0xd   :  { %s1716_s12 = smov 64   ;;  %s1717_s13 = smov 4  }
   0xe   :  { %45 = dma.hbm_to_vmem [thread:$0]  %s1884_s3, 2048, %s40_s10, [#allocation6], %s1716_s12, %s1716_s12, %s1717_s13  }
   0xf   :  { %s1718_s16 = smov [#allocation2]  }
  0x10   :  { %s25_s17 = sshll.u32 %s1718_s16, 4  ;;  %s26_s17 = int_to_ptr.vmem [resolvable:$true] %s25_s17 }
  0x11   :  { %s1635_s18 = scalar_lea.vmem %s26_s17, 6144  ;;  %p1640_p6 = scmp.lt.s32.totalorder %s26_s17, %s26_s17 }
  0x12   :  { %p1636_p5 = scmp.ne.s32.totalorder %s26_s17, %s1635_s18  ;;  %p1641_p7 = scmp.lt.s32.totalorder %s1635_s18, %s1635_s18 }
  0x14   :  { %p1642_p8 = por %p1641_p7, %p1640_p6 }
  0x16   :  { %p1643_p9 = pnand %p1642_p8, %p1636_p5 }
  0x18   :  { %1646 = shalt.err (!%p1643_p9)
}
  0x19   :  { %s1719_s19 = smov 192   ;;  %s1720_s20 = smov 12  }
  0x1a   :  { %31 = dma.hbm_to_vmem [thread:$0]  %s1882_s1, 6144, %s26_s17, [#allocation3], %s1719_s19, %s1719_s19, %s1720_s20  }
  0x1b   :  { %s1721_s23 = smov [#allocation7]  }
  0x1c   :  { %s53_s24 = sshll.u32 %s1721_s23, 4  ;;  %s54_s24 = int_to_ptr.vmem [resolvable:$true] %s53_s24 }
  0x1d   :  { %s1655_s3 = scalar_lea.vmem %s54_s24, 2048  ;;  %p1660_p11 = scmp.lt.s32.totalorder %s54_s24, %s54_s24 }
  0x1e   :  { %p1656_p10 = scmp.ne.s32.totalorder %s54_s24, %s1655_s3  ;;  %p1661_p12 = scmp.lt.s32.totalorder %s1655_s3, %s1655_s3 }
  0x20   :  { %p1662_p13 = por %p1661_p12, %p1660_p11 }
  0x22   :  { %p1663_p0 = pnand %p1662_p13, %p1656_p10 }
  0x24   :  { %1666 = shalt.err (!%p1663_p0)
}
  0x25   :  { %s1722_s25 = smov 128   ;;  %s1723_s26 = smov 8  }
  0x26   :  { %59 = dma.hbm_to_vmem [thread:$0]  %s1886_s5, 2048, %s54_s24, [#allocation6], %s1722_s25, %s1722_s25, %s1723_s26  }
  0x27   :  { %s1724_s29 = smov [#allocation8]  }
  0x28   :  { %s67_s30 = sshll.u32 %s1724_s29, 4  ;;  %s68_s30 = int_to_ptr.vmem [resolvable:$true] %s67_s30 }
  0x29   :  { %s1675_s1 = scalar_lea.vmem %s68_s30, 2048  ;;  %p1680_p2 = scmp.lt.s32.totalorder %s68_s30, %s68_s30 }
  0x2a   :  { %p1676_p1 = scmp.ne.s32.totalorder %s68_s30, %s1675_s1  ;;  %p1681_p3 = scmp.lt.s32.totalorder %s1675_s1, %s1675_s1 }
  0x2c   :  { %p1682_p4 = por %p1681_p3, %p1680_p2 }
  0x2e   :  { %p1683_p5 = pnand %p1682_p4, %p1676_p1 }
  0x30   :  { %1686 = shalt.err (!%p1683_p5)
}
  0x31   :  { %73 = dma.hbm_to_vmem [thread:$0]  %s1888_s7, 2048, %s68_s30, [#allocation9], %s1716_s12, %s1716_s12, %s1717_s13  }
  0x32   :  { %1707 = dma.done.wait [#allocation3], 6144  }
  0x33   :  { %1708 = vsyncadd [#allocation3], 4294961152 }
  0x34   :  { %1709 = dma.done.wait [#allocation6], 4096  }
  0x35   :  { %1710 = vsyncadd [#allocation6], 4294963200 }
  0x36   :  { %1711 = dma.done.wait [#allocation9], 2048  }
  0x37   :  { %1712 = vsyncadd [#allocation9], 4294965248  ;;  %v1475_v0 = vld [vmem:[#allocation2 + $0xac] ss:$12 sps:$4 sm:$0xff]   ;;  %v1477_v1 = vld [vmem:[#allocation2 + $0xa8] ss:$12 sps:$4 sm:$0xff]  }
  0x38   :  { %414 = vmatprep.subr.bf16.mxu0 %v1475_v0  ;;  %v1478_v2 = vld [vmem:[#allocation2 + $0x94] ss:$12 sps:$4 sm:$0xff]   ;;  %v1480_v3 = vld [vmem:[#allocation2 + $0x90] ss:$12 sps:$4 sm:$0xff]   ;;  %v1483_v5 = vld [vmem:[#allocation2 + $0x78] ss:$12 sps:$4 sm:$0xff]  }
  0x39   :  { %415 = vmatpush1.bf16.msra.mxu0 %v1477_v1  ;;  %v1481_v4 = vld [vmem:[#allocation2 + $0x7c] ss:$12 sps:$4 sm:$0xff]   ;;  %v1484_v6 = vld [vmem:[#allocation2 + $0x64] ss:$12 sps:$4 sm:$0xff]   ;;  %v1486_v7 = vld [vmem:[#allocation2 + $0x60] ss:$12 sps:$4 sm:$0xff]  }
  0x3a   :  { %416 = vmatprep.subr.bf16.mxu0 %v1478_v2  ;;  %v1487_v8 = vld [vmem:[#allocation2 + $0x4c] ss:$12 sps:$4 sm:$0xff]   ;;  %v1489_v9 = vld [vmem:[#allocation2 + $0x48] ss:$12 sps:$4 sm:$0xff]   ;;  %v1492_v11 = vld [vmem:[#allocation2 + $0x30] ss:$12 sps:$4 sm:$0xff]  }
  0x3b   :  { %v1490_v10 = vld [vmem:[#allocation2 + $0x34] ss:$12 sps:$4 sm:$0xff]   ;;  %v1493_v12 = vld [vmem:[#allocation2 + $0x1c] ss:$12 sps:$4 sm:$0xff]   ;;  %v1495_v13 = vld [vmem:[#allocation2 + $0x18] ss:$12 sps:$4 sm:$0xff]  }
  0x3c   :  { %v90_v14 = vld [vmem:[%s1881_s0 + $0x8] sm:$0xff]  ;;  %v1496_v15 = vld [vmem:[#allocation2 + $0x4] ss:$12 sps:$4 sm:$0xff]   ;;  %v1502_v21 = vld [vmem:[#allocation2 + $0x154] ss:$12 sps:$4 sm:$0xff]   ;;  %s1727_s18 = smov [#allocation10]  }
  0x3d   :  { %417 = vmatpush1.bf16.msra.mxu0 %v1480_v3  ;;  %v92_v16 = vpack.c.bf16 %v90_v14, %v90_v14  ;;  %v1523_v17 = vld [vmem:[#allocation2 + $0x170] ss:$12 sps:$4 sm:$0xff]   ;;  %v1498_v18 = vld [vmem:[#allocation2] ss:$12 sps:$4 sm:$0xff]   ;;  %v1501_v20 = vld [vmem:[#allocation2 + $0x168] ss:$12 sps:$4 sm:$0xff]  }
  0x3e   :  { %418 = vmatprep.subr.bf16.mxu0 %v1481_v4  ;;  %1396 = vmatprep.subr.bf16.mxu1 %v1523_v17  ;;  %v1499_v19 = vld [vmem:[#allocation2 + $0x16c] ss:$12 sps:$4 sm:$0xff]   ;;  %v1504_v22 = vld [vmem:[#allocation2 + $0x150] ss:$12 sps:$4 sm:$0xff]   ;;  %v1513_v28 = vld [vmem:[#allocation2 + $0x108] ss:$12 sps:$4 sm:$0xff]  }
  0x3f   :  { %446 = vmatprep.mubr.bf16.mxu0 %v92_v16  ;;  %487 = vmatprep.mubr.bf16.mxu1 %v92_v16  ;;  %v1505_v23 = vld [vmem:[#allocation2 + $0x13c] ss:$12 sps:$4 sm:$0xff]   ;;  %v1507_v24 = vld [vmem:[#allocation2 + $0x138] ss:$12 sps:$4 sm:$0xff]   ;;  %v1510_v26 = vld [vmem:[#allocation2 + $0x120] ss:$12 sps:$4 sm:$0xff]  }
  0x40   :  { %v1508_v25 = vld [vmem:[#allocation2 + $0x124] ss:$12 sps:$4 sm:$0xff]   ;;  %v1511_v27 = vld [vmem:[#allocation2 + $0x10c] ss:$12 sps:$4 sm:$0xff]   ;;  %v1514_v29 = vld [vmem:[#allocation2 + $0xf4] ss:$12 sps:$4 sm:$0xff]  }
  0x41   :  { %419 = vmatpush1.bf16.msra.mxu0 %v1483_v5  ;;  %v1516_v30 = vld [vmem:[#allocation2 + $0xf0] ss:$12 sps:$4 sm:$0xff]   ;;  %v1519_v32 = vld [vmem:[#allocation2 + $0xd8] ss:$12 sps:$4 sm:$0xff]   ;;  %v1522_v34 = vld [vmem:[#allocation2 + $0xc0] ss:$12 sps:$4 sm:$0xff]  }
  0x42   :  { %420 = vmatprep.subr.bf16.mxu0 %v1484_v6  ;;  %v1517_v31 = vld [vmem:[#allocation2 + $0xdc] ss:$12 sps:$4 sm:$0xff]   ;;  %v1520_v33 = vld [vmem:[#allocation2 + $0xc4] ss:$12 sps:$4 sm:$0xff]   ;;  %v1527_v40 = vld [vmem:[#allocation2 + $0x140] ss:$12 sps:$4 sm:$0xff]  }
  0x43   :  { %v89_v35 = vld [vmem:[%s1881_s0] sm:$0xff]  ;;  %v1524_v37 = vld [vmem:[#allocation2 + $0xb0] ss:$12 sps:$4 sm:$0xff]   ;;  %v1529_v42 = vld [vmem:[#allocation2 + $0x128] ss:$12 sps:$4 sm:$0xff]   ;;  %s1289_s19 = sshll.u32 %s1727_s18, 4  ;;  %s1290_s19 = int_to_ptr.vmem [resolvable:$true] %s1289_s19 }
  0x44   :  { %v91_v36 = vpack.c.bf16 %v89_v35, %v89_v35  ;;  %1397 = vmatpush3.bf16.msra.mxu1 %v1524_v37  ;;  %v1525_v38 = vld [vmem:[#allocation2 + $0x158] ss:$12 sps:$4 sm:$0xff]   ;;  %v1528_v41 = vld [vmem:[#allocation2 + $0x80] ss:$12 sps:$4 sm:$0xff]   ;;  %v1530_v43 = vld [vmem:[#allocation2 + $0x68] ss:$12 sps:$4 sm:$0xff]   ;;  %p1692_p7 = scmp.lt.s32.totalorder %s1290_s19, %s1290_s19 }
  0x45   :  { %421 = vmatpush1.bf16.msra.mxu0 %v1486_v7  ;;  %v1526_v39 = vld [vmem:[#allocation2 + $0x98] ss:$12 sps:$4 sm:$0xff]   ;;  %1398 = vmatprep.subr.bf16.mxu1 %v1525_v38  ;;  %v1531_v44 = vld [vmem:[#allocation2 + $0x110] ss:$12 sps:$4 sm:$0xff]   ;;  %v1535_v48 = vld [vmem:[#allocation2 + $0xe0] ss:$12 sps:$4 sm:$0xff]  }
  0x46   :  { %422 = vmatprep.subr.bf16.mxu0 %v1487_v8  ;;  %v1532_v45 = vld [vmem:[#allocation2 + $0x50] ss:$12 sps:$4 sm:$0xff]   ;;  %v1533_v46 = vld [vmem:[#allocation2 + $0xf8] ss:$12 sps:$4 sm:$0xff]   ;;  %v1536_v49 = vld [vmem:[#allocation2 + $0x20] ss:$12 sps:$4 sm:$0xff]  }
  0x47   :  { %v1534_v47 = vld [vmem:[#allocation2 + $0x38] ss:$12 sps:$4 sm:$0xff]   ;;  %v1537_v50 = vld [vmem:[#allocation2 + $0xc8] ss:$12 sps:$4 sm:$0xff]  }
  0x48   :  { %1399 = vmatpush3.bf16.msra.mxu1 %v1526_v39  ;;  %v1538_v51 = vld [vmem:[#allocation2 + $0x8] ss:$12 sps:$4 sm:$0xff]   ;;  %v1539_v52 = vld [vmem:[#allocation5 + $0x78] sm:$0xff]   ;;  %v1545_v58 = vld [vmem:[#allocation5 + $0x60] sm:$0xff]  }
  0x49   :  { %423 = vmatpush1.bf16.msra.mxu0 %v1489_v9  ;;  %1400 = vmatprep.subr.bf16.mxu1 %v1527_v40  ;;  %v1540_v53 = vld [vmem:[#allocation5 + $0x38] sm:$0xff]   ;;  %v1541_v54 = vld [vmem:[#allocation5 + $0x70] sm:$0xff]   ;;  %v1543_v56 = vld [vmem:[#allocation5 + $0x68] sm:$0xff]  }
  0x4a   :  { %424 = vmatprep.subr.bf16.mxu0 %v1490_v10  ;;  %v1542_v55 = vld [vmem:[#allocation5 + $0x30] sm:$0xff]   ;;  %v1544_v57 = vld [vmem:[#allocation5 + $0x28] sm:$0xff]   ;;  %v1546_v59 = vld [vmem:[#allocation5 + $0x20] sm:$0xff]  }
  0x4b   :  { %v1547_v60 = vld [vmem:[#allocation5 + $0x58] sm:$0xff]   ;;  %v1549_v62 = vld [vmem:[#allocation5 + $0x50] sm:$0xff]   ;;  %v1551_v0 = vld [vmem:[#allocation5 + $0x48] sm:$0xff]  }
  0x4c   :  { %1401 = vmatpush3.bf16.msra.mxu1 %v1528_v41  ;;  %v1548_v61 = vld [vmem:[#allocation5 + $0x18] sm:$0xff]   ;;  %v1550_v63 = vld [vmem:[#allocation5 + $0x10] sm:$0xff]   ;;  %v1552_v1 = vld [vmem:[#allocation5 + $0x8] sm:$0xff]  }
  0x4d   :  { %425 = vmatpush1.bf16.msra.mxu0 %v1492_v11  ;;  %1402 = vmatprep.subr.bf16.mxu1 %v1529_v42  ;;  %v1553_v2 = vld [vmem:[#allocation5 + $0x40] sm:$0xff]  }
  0x4e   :  { %426 = vmatprep.subr.bf16.mxu0 %v1493_v12  ;;  %v1554_v3 = vld [vmem:[#allocation5] sm:$0xff]  }
  0x50   :  { %1403 = vmatpush3.bf16.msra.mxu1 %v1530_v43 }
  0x51   :  { %427 = vmatpush1.bf16.msra.mxu0 %v1495_v13  ;;  %1404 = vmatprep.subr.bf16.mxu1 %v1531_v44  ;;  %v495_v44 = vlaneseq }
  0x52   :  { %428 = vmatprep.subr.bf16.mxu0 %v1496_v15 }
  0x54   :  { %1405 = vmatpush3.bf16.msra.mxu1 %v1532_v45  ;;  %v1725_v45 = vmov 1983009808  }
  0x55   :  { %429 = vmatpush1.bf16.msra.mxu0 %v1498_v18  ;;  %1406 = vmatprep.subr.bf16.mxu1 %v1533_v46  ;;  %v546_v46 = vunpack.c.l.s4 %v1725_v45 }
  0x56   :  { %430 = vmatprep.subr.bf16.mxu0 %v1499_v19 }
  0x58   :  { %1407 = vmatpush3.bf16.msra.mxu1 %v1534_v47  ;;  %v1814_v47 = vshrl.u32 %v495_v44, 7 }
  0x59   :  { %431 = vmatpush2.bf16.msra.mxu0 %v1501_v20  ;;  %1408 = vmatprep.subr.bf16.mxu1 %v1535_v48  ;;  %v547_v48 = vunpack.c.0.s8 %v546_v46 }
  0x5a   :  { %432 = vmatprep.subr.bf16.mxu0 %v1502_v21 }
  0x5c   :  { %1409 = vmatpush3.bf16.msra.mxu1 %v1536_v49 }
  0x5d   :  { %433 = vmatpush2.bf16.msra.mxu0 %v1504_v22  ;;  %1410 = vmatprep.subr.bf16.mxu1 %v1537_v50  ;;  %v1817_v50 = vsub.s32 %v547_v48, %v1814_v47 }
  0x5e   :  { %434 = vmatprep.subr.bf16.mxu0 %v1505_v23 }
  0x60   :  { %1411 = vmatpush3.bf16.msra.mxu1 %v1538_v51 }
  0x61   :  { %435 = vmatpush2.bf16.msra.mxu0 %v1507_v24  ;;  %1418 = vmatprep.subr.bf16.mxu1 %v1539_v52 }
  0x62   :  { %436 = vmatprep.subr.bf16.mxu0 %v1508_v25 }
  0x63   :  { %488 = vmatmul.mubr.bf16.vlgmr.msra.gmra.mxu1 %v91_v36 }
  0x64   :  { %1419 = vmatpush3.bf16.msra.mxu1 %v1540_v53  ;;  %v502_v53 = vld [vmem:[%s1883_s2] sm:$0xf] }
  0x65   :  { %437 = vmatpush2.bf16.msra.mxu0 %v1510_v26  ;;  %1420 = vmatprep.subr.bf16.mxu1 %v1541_v54  ;;  %v1823_v54 = vsub.s32 2, %v1814_v47 }
  0x66   :  { %438 = vmatprep.subr.bf16.mxu0 %v1511_v27 }
  0x68   :  { %1421 = vmatpush3.bf16.msra.mxu1 %v1542_v55 }
  0x69   :  { %439 = vmatpush2.bf16.msra.mxu0 %v1513_v28  ;;  %1422 = vmatprep.subr.bf16.mxu1 %v1543_v56  ;;  %v1827_v56 = vsub.s32 0, %v1814_v47 }
  0x6a   :  { %440 = vmatprep.subr.bf16.mxu0 %v1514_v29 }
  0x6c   :  { %1423 = vmatpush3.bf16.msra.mxu1 %v1544_v57 }
  0x6d   :  { %441 = vmatpush2.bf16.msra.mxu0 %v1516_v30  ;;  %1424 = vmatprep.subr.bf16.mxu1 %v1545_v58 }
  0x6e   :  { %442 = vmatprep.subr.bf16.mxu0 %v1517_v31 }
  0x70   :  { %1425 = vmatpush3.bf16.msra.mxu1 %v1546_v59 }
  0x71   :  { %443 = vmatpush2.bf16.msra.mxu0 %v1519_v32  ;;  %1426 = vmatprep.subr.bf16.mxu1 %v1547_v60 }
  0x72   :  { %444 = vmatprep.subr.bf16.mxu0 %v1520_v33 }
  0x74   :  { %1427 = vmatpush3.bf16.msra.mxu1 %v1548_v61 }
  0x75   :  { %445 = vmatpush2.bf16.msra.mxu0 %v1522_v34  ;;  %1428 = vmatprep.subr.bf16.mxu1 %v1549_v62 }
  0x78   :  { %447 = vmatmul.mubr.bf16.vlgmr.msra.gmra.mxu0 %v91_v36  ;;  %1429 = vmatpush3.bf16.msra.mxu1 %v1550_v63 }
  0x79   :  { %1430 = vmatprep.subr.bf16.mxu1 %v1551_v0  ;;  %v1833_v0 = vsub.s32 1, %v1814_v47 }
  0x7c   :  { %1431 = vmatpush3.bf16.msra.mxu1 %v1552_v1 }
  0x7d   :  { %1432 = vmatprep.subr.bf16.mxu1 %v1553_v2  ;;  %v597_v2 = vsub.s32 3, %v1814_v47 }
  0x80   :  { %1433 = vmatpush3.bf16.msra.mxu1 %v1554_v3 }
 0x138   :  { %v1802_v4 = vpop.f32.mrf.mxu0 }
 0x139   :  { %v503_v5 = vrot.slane %v1802_v4, 4  ;;  %v518_v6 = vmul.f32 %v1802_v4, %v1802_v4 }
 0x13a   :  { %v1807_v7 = vpop.f32.mrf.mxu0 }
 0x13b   :  { %v504_v8 = vadd.f32 %v503_v5, %v1802_v4  ;;  %v520_v9 = vrot.slane %v518_v6, 4  ;;  %v509_v10 = vrot.slane %v1807_v7, 4  ;;  %v519_v11 = vmul.f32 %v1807_v7, %v1807_v7 }
 0x13c   :  { %v452_v12 = vpop.f32.mrf.mxu0 }
 0x13d   :  { %v505_v13 = vrot.slane %v504_v8, 2  ;;  %v521_v14 = vadd.f32 %v520_v9, %v518_v6  ;;  %v510_v15 = vadd.f32 %v509_v10, %v1807_v7  ;;  %v526_v16 = vrot.slane %v519_v11, 4 }
 0x13e   :  { %v453_v17 = vpop.f32.mrf.mxu0 }
 0x13f   :  { %v506_v18 = vadd.f32 %v505_v13, %v504_v8  ;;  %v522_v19 = vrot.slane %v521_v14, 2  ;;  %v511_v20 = vrot.slane %v510_v15, 2  ;;  %v527_v21 = vadd.f32 %v526_v16, %v519_v11 }
 0x141   :  { %v507_v22 = vrot.slane %v506_v18, 1  ;;  %v523_v23 = vadd.f32 %v522_v19, %v521_v14  ;;  %v512_v24 = vadd.f32 %v511_v20, %v510_v15  ;;  %v528_v25 = vrot.slane %v527_v21, 2 }
 0x143   :  { %v508_v26 = vadd.f32 %v507_v22, %v506_v18  ;;  %v524_v27 = vrot.slane %v523_v23, 1  ;;  %v513_v28 = vrot.slane %v512_v24, 1  ;;  %v529_v29 = vadd.f32 %v528_v25, %v527_v21  ;;  %v1412_v22 = vpop.f32.mrf.mxu1 }
 0x145   :  { %v516_v30 = vmul.f32 0.125, %v508_v26  ;;  %v525_v31 = vadd.f32 %v524_v27, %v523_v23  ;;  %v514_v32 = vadd.f32 %v513_v28, %v512_v24  ;;  %v530_v33 = vrot.slane %v529_v29, 1  ;;  %v1413_v23 = vpop.f32.mrf.mxu1  ;;  %v1557_v26 = vld [vmem:[#allocation7 + $0x74] ss:$8 sps:$4 sm:$0xff]   ;;  %v1560_v27 = vld [vmem:[#allocation7 + $0x64] ss:$8 sps:$4 sm:$0xff]  }
 0x146   :  { %v1845_v24 = vadd.f32 %v1413_v23, %v1412_v22  ;;  %921 = vmatprep.subr.bf16.mxu0 %v1557_v26  ;;  %v1558_v28 = vld [vmem:[#allocation7 + $0x60] ss:$8 sps:$4 sm:$0xff]  }
 0x147   :  { %v532_v34 = vmul.f32 0.125, %v525_v31  ;;  %v534_v35 = vmul.f32 %v516_v30, %v516_v30  ;;  %v517_v36 = vmul.f32 0.125, %v514_v32  ;;  %v531_v37 = vadd.f32 %v530_v33, %v529_v29  ;;  %v1563_v29 = vld [vmem:[#allocation7 + $0x54] ss:$8 sps:$4 sm:$0xff]   ;;  %v1566_v31 = vld [vmem:[#allocation7 + $0x44] ss:$8 sps:$4 sm:$0xff]  }
 0x148   :  { %v1564_v32 = vld [vmem:[#allocation7 + $0x40] ss:$8 sps:$4 sm:$0xff]   ;;  %v1569_v33 = vld [vmem:[#allocation7 + $0x34] ss:$8 sps:$4 sm:$0xff]  }
 0x149   :  { %v536_v38 = vsub.f32 %v532_v34, %v534_v35  ;;  %v533_v39 = vmul.f32 0.125, %v531_v37  ;;  %v535_v40 = vmul.f32 %v517_v36, %v517_v36  ;;  %v1567_v34 = vld [vmem:[#allocation7 + $0x30] ss:$8 sps:$4 sm:$0xff]   ;;  %v1572_v35 = vld [vmem:[#allocation7 + $0x24] ss:$8 sps:$4 sm:$0xff]  }
 0x14a   :  { %v1573_v37 = vld [vmem:[#allocation7 + $0x10] ss:$8 sps:$4 sm:$0xff]  }
 0x14b   :  { %v538_v41 = vadd.f32 1e-05, %v536_v38  ;;  %v537_v42 = vsub.f32 %v533_v39, %v535_v40  ;;  %v1575_v38 = vld [vmem:[#allocation7 + $0x14] ss:$8 sps:$4 sm:$0xff]   ;;  %v1578_v39 = vld [vmem:[#allocation7 + $0x4] ss:$8 sps:$4 sm:$0xff]  }
 0x14c   :  { %v1726_v40 = vmov 0  }
 0x14d   :  { %v539_v43 = vadd.f32 1e-05, %v537_v42  ;;  %1595 = vrsqrt.f32 %v538_v41  ;;  %953 = vmatprep.mubr.bf16.mxu0 %v1726_v40  ;;  %v1576_v41 = vld [vmem:[#allocation7] ss:$8 sps:$4 sm:$0xff]  }
 0x14e   :  { %v1594_v40 = vld [vmem:[#allocation8] sm:$0xff]  }
 0x14f   :  { %1597 = vrsqrt.f32 %v539_v43 }
 0x15a   :  { %v1596_v49 = vpop.eup %1595 }
 0x15c   :  { %v1598_v51 = vpop.eup %1597 }
 0x15d   :  { %v544_v52 = vcombine.low %v1596_v49, %v1598_v51 }
 0x15f   :  { %v551_v55 = vrot.slane %v544_v52, %v1817_v50 }
 0x161   :  { %v553_v57 = vmul.f32 %v551_v55, %v502_v53 }
 0x163   :  { %v558_v58 = vrot.slane %v553_v57, %v1827_v56  ;;  %v562_v59 = vrot.slane %v553_v57, %v1823_v54 }
 0x165   :  { %v565_v60 = vmul.f32 %v558_v58, %v516_v30  ;;  %v566_v61 = vmul.f32 %v562_v59, %v517_v36  ;;  %v587_v3 = vrot.slane %v562_v59, %v1827_v56  ;;  %v583_v6 = vrot.slane %v558_v58, %v1827_v56  ;;  %v1561_v30 = vld [vmem:[#allocation7 + $0x50] ss:$8 sps:$4 sm:$0xff]   ;;  %v1570_v36 = vld [vmem:[#allocation7 + $0x20] ss:$8 sps:$4 sm:$0xff]  }
 0x167   :  { %v569_v62 = vcombine.low %v565_v60, %v566_v61  ;;  %v589_v10 = vmul.f32 %v587_v3, %v1807_v7  ;;  %v588_v12 = vmul.f32 %v583_v6, %v1802_v4  ;;  %v1415_v7 = vpop.f32.mrf.mxu1  ;;  %v1555_v4 = vld [vmem:[#allocation7 + $0x70] ss:$8 sps:$4 sm:$0xff]  }
 0x168   :  { %922 = vmatpush1.bf16.msra.mxu0 %v1555_v4  ;;  %v1580_v4 = vld [vmem:[#allocation8 + $0x38] sm:$0xff]  }
 0x169   :  { %v576_v63 = vrot.slane %v569_v62, %v1817_v50  ;;  %v1416_v25 = vpop.f32.mrf.mxu1  ;;  %923 = vmatprep.subr.bf16.mxu0 %v1560_v27  ;;  %v1581_v27 = vld [vmem:[#allocation8 + $0x70] sm:$0xff]  }
 0x16b   :  { %v577_v1 = vrot.slane %v576_v63, 7 }
 0x16c   :  { %924 = vmatpush1.bf16.msra.mxu0 %v1558_v28  ;;  %v1582_v28 = vld [vmem:[#allocation8 + $0x30] sm:$0xff]  }
 0x16d   :  { %v579_v5 = vsub.f32 %v502_v53, %v577_v1  ;;  %925 = vmatprep.subr.bf16.mxu0 %v1563_v29  ;;  %v1583_v29 = vld [vmem:[#allocation8 + $0x68] sm:$0xff]  }
 0x16f   :  { %v598_v8 = vrot.slane %v579_v5, %v597_v2  ;;  %v594_v9 = vrot.slane %v579_v5, %v1833_v0 }
 0x170   :  { %926 = vmatpush1.bf16.msra.mxu0 %v1561_v30  ;;  %v1584_v30 = vld [vmem:[#allocation8 + $0x28] sm:$0xff]  }
 0x171   :  { %v608_v11 = vrot.slane %v598_v8, %v1833_v0  ;;  %v604_v13 = vrot.slane %v594_v9, %v1833_v0  ;;  %927 = vmatprep.subr.bf16.mxu0 %v1566_v31  ;;  %v93_v9 = vld [vmem:[%s1885_s4] sm:$0x7] }
 0x172   :  { %v1585_v31 = vld [vmem:[#allocation8 + $0x60] sm:$0xff]  }
 0x173   :  { %v610_v14 = vadd.f32 %v608_v11, %v589_v10  ;;  %v609_v15 = vadd.f32 %v604_v13, %v588_v12  ;;  %v498_v10 = vrot.slane %v93_v9, %v1823_v54 }
 0x174   :  { %928 = vmatpush1.bf16.msra.mxu0 %v1564_v32  ;;  %v1586_v32 = vld [vmem:[#allocation8 + $0x20] sm:$0xff]  }
 0x175   :  { %v612_v16 = vmul.f32 0.2, %v610_v14  ;;  %v611_v17 = vmul.f32 0.2, %v609_v15  ;;  %929 = vmatprep.subr.bf16.mxu0 %v1569_v33  ;;  %v499_v13 = vadd.f32 %v1845_v24, %v498_v10  ;;  %v1579_v24 = vld [vmem:[#allocation8 + $0x78] sm:$0xff]  }
 0x176   :  { %1440 = vmatprep.subr.bf16.mxu1 %v1579_v24  ;;  %v1587_v33 = vld [vmem:[#allocation8 + $0x58] sm:$0xff]  }
 0x177   :  { %v614_v18 = vmax.f32 %v610_v14, %v612_v16  ;;  %v613_v19 = vmax.f32 %v609_v15, %v611_v17  ;;  %v500_v17 = vmul.f32 0.2, %v499_v13 }
 0x178   :  { %930 = vmatpush1.bf16.msra.mxu0 %v1567_v34  ;;  %v1588_v34 = vld [vmem:[#allocation8 + $0x18] sm:$0xff]  }
 0x179   :  { %v616_v20 = vpack.c.bf16 %v614_v18, %v614_v18  ;;  %v615_v21 = vpack.c.bf16 %v613_v19, %v613_v19  ;;  %931 = vmatprep.subr.bf16.mxu0 %v1572_v35  ;;  %v1589_v35 = vld [vmem:[#allocation8 + $0x50] sm:$0xff]  }
 0x17b   :  { %777 = vmatprep.mubr.bf16.mxu1 %v616_v20 }
 0x17c   :  { %778 = vmatmul.mubr.bf16.vlgmr.msra.gmra.mxu1 %v615_v21  ;;  %932 = vmatpush1.bf16.msra.mxu0 %v1570_v36  ;;  %v501_v21 = vmax.f32 %v499_v13, %v500_v17  ;;  %v1590_v36 = vld [vmem:[#allocation8 + $0x10] sm:$0xff]  }
 0x17d   :  { %933 = vmatprep.subr.bf16.mxu0 %v1575_v38  ;;  %1441 = vmatpush3.bf16.msra.mxu1 %v1580_v4  ;;  %v1592_v38 = vld [vmem:[#allocation8 + $0x8] sm:$0xff]  }
 0x17e   :  { %1442 = vmatprep.subr.bf16.mxu1 %v1581_v27  ;;  %v962_v27 = vld [vmem:[%s1887_s6] sm:$0xf] }
 0x180   :  { %934 = vmatpush1.bf16.msra.mxu0 %v1573_v37  ;;  %v1591_v37 = vld [vmem:[#allocation8 + $0x48] sm:$0xff]  }
 0x181   :  { %935 = vmatprep.subr.bf16.mxu0 %v1578_v39  ;;  %1443 = vmatpush3.bf16.msra.mxu1 %v1582_v28  ;;  %v1593_v39 = vld [vmem:[#allocation8 + $0x40] sm:$0xff]  }
 0x182   :  { %1444 = vmatprep.subr.bf16.mxu1 %v1583_v29 }
 0x184   :  { %936 = vmatpush1.bf16.msra.mxu0 %v1576_v41 }
 0x185   :  { %1445 = vmatpush3.bf16.msra.mxu1 %v1584_v30 }
 0x186   :  { %1446 = vmatprep.subr.bf16.mxu1 %v1585_v31 }
 0x189   :  { %1447 = vmatpush3.bf16.msra.mxu1 %v1586_v32 }
 0x18a   :  { %1448 = vmatprep.subr.bf16.mxu1 %v1587_v33 }
 0x18d   :  { %1449 = vmatpush3.bf16.msra.mxu1 %v1588_v34 }
 0x18e   :  { %1450 = vmatprep.subr.bf16.mxu1 %v1589_v35 }
 0x191   :  { %1451 = vmatpush3.bf16.msra.mxu1 %v1590_v36 }
 0x192   :  { %1452 = vmatprep.subr.bf16.mxu1 %v1591_v37 }
 0x195   :  { %1453 = vmatpush3.bf16.msra.mxu1 %v1592_v38 }
 0x196   :  { %1454 = vmatprep.subr.bf16.mxu1 %v1593_v39 }
 0x199   :  { %1455 = vmatpush3.bf16.msra.mxu1 %v1594_v40 }
 0x23c   :  { %v1434_v42 = vpop.f32.mrf.mxu1 }
 0x23e   :  { %v1435_v43 = vpop.f32.mrf.mxu1 }
 0x23f   :  { %v1436_v44 = vadd.f32 %v1435_v43, %v1434_v42 }
 0x240   :  { %v1437_v45 = vpop.f32.mrf.mxu1 }
 0x241   :  { %v785_v46 = vrot.slane %v1436_v44, 4  ;;  %v792_v48 = vmul.f32 %v1436_v44, %v1436_v44 }
 0x242   :  { %v1438_v49 = vpop.f32.mrf.mxu1 }
 0x243   :  { %v786_v51 = vadd.f32 %v1436_v44, %v785_v46  ;;  %v793_v52 = vrot.slane %v792_v48, 4 }
 0x245   :  { %v787_v53 = vrot.slane %v786_v51, 2  ;;  %v794_v55 = vadd.f32 %v793_v52, %v792_v48 }
 0x247   :  { %v788_v57 = vadd.f32 %v787_v53, %v786_v51  ;;  %v795_v58 = vrot.slane %v794_v55, 2 }
 0x249   :  { %v789_v59 = vrot.slane %v788_v57, 1  ;;  %v796_v60 = vadd.f32 %v795_v58, %v794_v55 }
 0x24b   :  { %v790_v61 = vadd.f32 %v789_v59, %v788_v57  ;;  %v797_v62 = vrot.slane %v796_v60, 1 }
 0x24d   :  { %v791_v63 = vmul.f32 0.125, %v790_v61  ;;  %v798_v1 = vadd.f32 %v797_v62, %v796_v60 }
 0x24f   :  { %v799_v3 = vmul.f32 0.125, %v798_v1  ;;  %v800_v5 = vmul.f32 %v791_v63, %v791_v63 }
 0x251   :  { %v801_v6 = vsub.f32 %v799_v3, %v800_v5 }
 0x253   :  { %v802_v8 = vadd.f32 1e-05, %v801_v6 }
 0x255   :  { %1599 = vrsqrt.f32 %v802_v8 }
 0x262   :  { %v1600_v11 = vpop.eup %1599 }
 0x263   :  { %v804_v12 = vmul.f32 %v1600_v11, %v93_v9 }
 0x265   :  { %v805_v14 = vmul.f32 %v804_v12, %v791_v63  ;;  %v813_v16 = vrot.slane %v804_v12, %v1827_v56 }
 0x267   :  { %v807_v15 = vrot.slane %v805_v14, 7  ;;  %v814_v19 = vmul.f32 %v1436_v44, %v813_v16 }
 0x269   :  { %v809_v18 = vsub.f32 %v93_v9, %v807_v15 }
 0x26b   :  { %v818_v20 = vrot.slane %v809_v18, %v1833_v0 }
 0x26d   :  { %v819_v22 = vadd.f32 %v818_v20, %v814_v19 }
 0x26f   :  { %v820_v23 = vadd.f32 %v819_v22, %v501_v21 }
 0x271   :  { %v821_v7 = vmul.f32 0.2, %v820_v23 }
 0x273   :  { %v1854_v25 = vmax.f32 %v820_v23, %v821_v7 }
 0x275   :  { %v823_v26 = vpack.c.bf16 %v1854_v25, %v1854_v25 }
 0x277   :  { %954 = vmatmul.mubr.bf16.vlgmr.msra.gmra.mxu0 %v823_v26 }
 0x337   :  { %v955_v41 = vpop.f32.mrf.mxu0 }
 0x338   :  { %v963_v42 = vrot.slane %v955_v41, 4  ;;  %v977_v43 = vmul.f32 %v955_v41, %v955_v41 }
 0x339   :  { %v957_v44 = vpop.f32.mrf.mxu0 }
 0x33a   :  { %v964_v45 = vadd.f32 %v963_v42, %v955_v41  ;;  %v979_v46 = vrot.slane %v977_v43, 4  ;;  %v969_v48 = vrot.slane %v957_v44, 4  ;;  %v978_v49 = vmul.f32 %v957_v44, %v957_v44 }
 0x33b   :  { %v959_v51 = vpop.f32.mrf.mxu0 }
 0x33c   :  { %v965_v52 = vrot.slane %v964_v45, 2  ;;  %v980_v53 = vadd.f32 %v979_v46, %v977_v43  ;;  %v970_v55 = vadd.f32 %v969_v48, %v957_v44  ;;  %v985_v57 = vrot.slane %v978_v49, 4 }
 0x33d   :  { %v960_v58 = vpop.f32.mrf.mxu0 }
 0x33e   :  { %v966_v59 = vadd.f32 %v965_v52, %v964_v45  ;;  %v981_v60 = vrot.slane %v980_v53, 2  ;;  %v971_v61 = vrot.slane %v970_v55, 2  ;;  %v986_v62 = vadd.f32 %v985_v57, %v978_v49 }
 0x340   :  { %v967_v63 = vrot.slane %v966_v59, 1  ;;  %v982_v1 = vadd.f32 %v981_v60, %v980_v53  ;;  %v972_v3 = vadd.f32 %v971_v61, %v970_v55  ;;  %v987_v5 = vrot.slane %v986_v62, 2 }
 0x342   :  { %v968_v6 = vadd.f32 %v967_v63, %v966_v59  ;;  %v983_v8 = vrot.slane %v982_v1, 1  ;;  %v973_v9 = vrot.slane %v972_v3, 1  ;;  %v988_v10 = vadd.f32 %v987_v5, %v986_v62 }
 0x344   :  { %v975_v11 = vmul.f32 0.125, %v968_v6  ;;  %v984_v12 = vadd.f32 %v983_v8, %v982_v1  ;;  %v974_v13 = vadd.f32 %v973_v9, %v972_v3  ;;  %v989_v14 = vrot.slane %v988_v10, 1 }
 0x346   :  { %v991_v15 = vmul.f32 0.125, %v984_v12  ;;  %v993_v16 = vmul.f32 %v975_v11, %v975_v11  ;;  %v976_v17 = vmul.f32 0.125, %v974_v13  ;;  %v990_v18 = vadd.f32 %v989_v14, %v988_v10 }
 0x348   :  { %v995_v19 = vsub.f32 %v991_v15, %v993_v16  ;;  %v992_v20 = vmul.f32 0.125, %v990_v18  ;;  %v994_v21 = vmul.f32 %v976_v17, %v976_v17 }
 0x34a   :  { %v997_v22 = vadd.f32 1e-05, %v995_v19  ;;  %v996_v23 = vsub.f32 %v992_v20, %v994_v21 }
 0x34c   :  { %v998_v7 = vadd.f32 1e-05, %v996_v23  ;;  %1601 = vrsqrt.f32 %v997_v22 }
 0x34e   :  { %1603 = vrsqrt.f32 %v998_v7 }
 0x359   :  { %v1602_v26 = vpop.eup %1601 }
 0x35b   :  { %v1604_v24 = vpop.eup %1603 }
 0x35c   :  { %v1003_v4 = vcombine.low %v1602_v26, %v1604_v24 }
 0x35e   :  { %v1010_v28 = vrot.slane %v1003_v4, %v1817_v50 }
 0x360   :  { %v1012_v29 = vmul.f32 %v1010_v28, %v962_v27 }
 0x362   :  { %v1017_v30 = vrot.slane %v1012_v29, %v1827_v56  ;;  %v1021_v31 = vrot.slane %v1012_v29, %v1823_v54 }
 0x364   :  { %v1024_v32 = vmul.f32 %v1017_v30, %v975_v11  ;;  %v1025_v33 = vmul.f32 %v1021_v31, %v976_v17  ;;  %v1046_v37 = vrot.slane %v1021_v31, %v1827_v56  ;;  %v1042_v39 = vrot.slane %v1017_v30, %v1827_v56  ;;  %v824_v17 = vld [vmem:[%s1889_s8] sm:$0x3]  ;;  %s1687_s8 = scalar_lea.vmem %s1290_s19, 128 }
 0x365   :  { %p1688_p6 = scmp.ne.s32.totalorder %s1290_s19, %s1687_s8  ;;  %p1693_p8 = scmp.lt.s32.totalorder %s1687_s8, %s1687_s8 }
 0x366   :  { %v1028_v34 = vcombine.low %v1024_v32, %v1025_v33  ;;  %v1048_v43 = vmul.f32 %v1046_v37, %v957_v44  ;;  %v1047_v54 = vmul.f32 %v1042_v39, %v955_v41 }
 0x367   :  { %p1694_p9 = por %p1693_p8, %p1692_p7 }
 0x368   :  { %v1035_v35 = vrot.slane %v1028_v34, %v1817_v50 }
 0x369   :  { %p1695_p10 = pnand %p1694_p9, %p1688_p6 }
 0x36a   :  { %v1036_v36 = vrot.slane %v1035_v35, 7 }
 0x36c   :  { %v1038_v38 = vsub.f32 %v962_v27, %v1036_v36 }
 0x36e   :  { %v1057_v40 = vrot.slane %v1038_v38, %v597_v2  ;;  %v1053_v42 = vrot.slane %v1038_v38, %v1833_v0 }
 0x370   :  { %v1067_v45 = vrot.slane %v1057_v40, %v1833_v0  ;;  %v1063_v46 = vrot.slane %v1053_v42, %v1833_v0 }
 0x372   :  { %v1069_v48 = vadd.f32 %v1067_v45, %v1048_v43  ;;  %v1068_v49 = vadd.f32 %v1063_v46, %v1047_v54 }
 0x374   :  { %v1071_v50 = vmul.f32 0.2, %v1069_v48  ;;  %v1070_v51 = vmul.f32 0.2, %v1068_v49 }
 0x376   :  { %v1073_v52 = vmax.f32 %v1069_v48, %v1071_v50  ;;  %v1072_v53 = vmax.f32 %v1068_v49, %v1070_v51 }
 0x378   :  { %v1075_v55 = vpack.c.bf16 %v1073_v52, %v1073_v52  ;;  %v1074_v57 = vpack.c.bf16 %v1072_v53, %v1072_v53 }
 0x37a   :  { %1236 = vmatprep.mubr.bf16.mxu1 %v1075_v55 }
 0x37b   :  { %1237 = vmatmul.mubr.bf16.vlgmr.msra.gmra.mxu1 %v1074_v57 }
 0x43b   :  { %v1456_v47 = vpop.f32.mrf.mxu1 }
 0x43d   :  { %v1457_v2 = vpop.f32.mrf.mxu1 }
 0x43e   :  { %v1458_v58 = vadd.f32 %v1457_v2, %v1456_v47 }
 0x43f   :  { %v1459_v59 = vpop.f32.mrf.mxu1 }
 0x440   :  { %v1244_v44 = vrot.slane %v1458_v58, 4  ;;  %v1251_v60 = vmul.f32 %v1458_v58, %v1458_v58 }
 0x441   :  { %v1460_v61 = vpop.f32.mrf.mxu1 }
 0x442   :  { %v1245_v41 = vadd.f32 %v1458_v58, %v1244_v44  ;;  %v1252_v62 = vrot.slane %v1251_v60, 4 }
 0x444   :  { %v1246_v63 = vrot.slane %v1245_v41, 2  ;;  %v1253_v1 = vadd.f32 %v1252_v62, %v1251_v60 }
 0x446   :  { %v1247_v3 = vadd.f32 %v1246_v63, %v1245_v41  ;;  %v1254_v5 = vrot.slane %v1253_v1, 2 }
 0x448   :  { %v1248_v6 = vrot.slane %v1247_v3, 1  ;;  %v1255_v8 = vadd.f32 %v1254_v5, %v1253_v1 }
 0x44a   :  { %v1249_v9 = vadd.f32 %v1248_v6, %v1247_v3  ;;  %v1256_v10 = vrot.slane %v1255_v8, 1 }
 0x44c   :  { %v1250_v11 = vmul.f32 0.125, %v1249_v9  ;;  %v1257_v12 = vadd.f32 %v1256_v10, %v1255_v8 }
 0x44e   :  { %v1258_v13 = vmul.f32 0.125, %v1257_v12  ;;  %v1259_v14 = vmul.f32 %v1250_v11, %v1250_v11 }
 0x450   :  { %v1260_v15 = vsub.f32 %v1258_v13, %v1259_v14 }
 0x452   :  { %v1261_v16 = vadd.f32 1e-05, %v1260_v15 }
 0x454   :  { %1605 = vrsqrt.f32 %v1261_v16 }
 0x461   :  { %v1606_v18 = vpop.eup %1605 }
 0x462   :  { %v1263_v19 = vmul.f32 %v1606_v18, %v824_v17 }
 0x464   :  { %v1264_v20 = vmul.f32 %v1263_v19, %v1250_v11  ;;  %v1272_v21 = vrot.slane %v1263_v19, %v1827_v56 }
 0x466   :  { %v1266_v22 = vrot.slane %v1264_v20, 7  ;;  %v1273_v7 = vmul.f32 %v1458_v58, %v1272_v21 }
 0x468   :  { %v1268_v23 = vsub.f32 %v824_v17, %v1266_v22 }
 0x46a   :  { %v1277_v26 = vrot.slane %v1268_v23, %v1833_v0 }
 0x46c   :  { %v1278_v24 = vadd.f32 %v1277_v26, %v1273_v7 }
 0x46e   :  { %v1279_v4 = vadd.f32 %v1278_v24, %v1854_v25 }
 0x470   :  { %v1280_v27 = vmul.f32 0.2, %v1279_v4 }
 0x472   :  { %v1281_v28 = vmax.f32 %v1279_v4, %v1280_v27 }
 0x474   :  { %1282 = vst [vmem:[#allocation10] sm:$0xff] %v1281_v28 }
 0x475   :  { %1698 = shalt.err (!%p1695_p10)
}
 0x476   :  { %1292 = dma.vmem_to_hbm [thread:$0]  %s1290_s19, 128, %s1890_s9, [#allocation4]  }
 0x477   :  { %1713 = dma.done.wait [#allocation4], 128  }
 0x478   :  { %1714 = vsyncadd [#allocation4], 4294967168 }
 0x479   :  { %1296 = vsyncpa [#allocation3], 1 }
 0x47a   :  { %1297 = vsyncpa [#allocation6], 1 }
 0x47b   :  { %1298 = vsyncpa [#allocation9], 1 }
 0x47c   :  { %1299 = vsyncpa [#allocation4], 1 }

</bundles_post_ra>
